<compile_context>
chip_gen: v7x
topology: tpu7x:2x2x1
jax: 0.10.0
libtpu: 0.0.40
codegen_flags: <defaults>
</compile_context>

<pallas_src>
import jax
import jax.numpy as jnp
from jax.experimental import pallas as pl
from jax.experimental.pallas import tpu as pltpu


def _ca_scale_kernel(x_ref, w1t_ref, b1_ref, s_ref, o_ref):
    # x_ref:   (Cin,  T)   spatial tile; channels on sublanes, HW on lanes
    # w1t_ref: (Cout, Cin) 1x1-conv weight, transposed for (Cout,T) output
    # b1_ref:  (Cout, 1)   bias, broadcast along lanes
    # s_ref:   (Cout, 1)   precomputed channel-attention scale for this batch
    # o_ref:   (Cout, T)
    x = x_ref[...].astype(jnp.float32)
    out = jnp.dot(w1t_ref[...].astype(jnp.float32), x,
                  preferred_element_type=jnp.float32) + b1_ref[...]
    o_ref[...] = (out * s_ref[...]).astype(o_ref.dtype)


def _pick_hw_tile(HW, Cin, Cout, itemsize, budget_bytes=32 * 1024 * 1024):
    """Largest HW tile that (a) is a multiple of 128, (b) divides HW evenly,
    and (c) keeps double-buffered (x_tile + out_tile) under `budget_bytes`.
    Falls back to the full HW extent when HW is not a multiple of 128
    (full-extent blocks are always layout-legal)."""
    if HW % 128 != 0:
        return HW
    per_col = 2 * (Cin + Cout) * itemsize          # 2 buffers x (in + out) col
    max_cols = max(128, budget_bytes // per_col)
    best = 128
    t = 128
    while t <= min(HW, max_cols):
        if HW % t == 0:
            best = t
        t += 128
    return best


def ca_layer(x_nchw, w1, b1, w2, b2, w3, b3):
    """CALayer forward.

    x_nchw: (N, Cin, H, W) float32.
    Weights are the 1x1 convs in matmul form:
      w1: (Cin, Cout),  b1: (1, Cout)
      w2: (Cout, Cmid), b2: (1, Cmid)
      w3: (Cmid, Cout), b3: (1, Cout)
    Returns (N, Cout, H, W).
    """
    N, Cin, H, W = x_nchw.shape
    HW = H * W
    Cout = w1.shape[1]

    # ---- squeeze/excite scale computed up front (tiny (N,C) math).
    # Linearity of the 1x1 conv w.r.t. global average pooling:
    #   mean_HW(x @ W1 + b1) = mean_HW(x) @ W1 + b1
    mx = jnp.mean(x_nchw, axis=(2, 3))                    # (N, Cin)
    y = mx @ w1 + b1                                      # (N, Cout) == pooled conv1
    h = jnp.maximum(y @ w2 + b2, 0.0)                     # (N, Cmid)
    s = jax.nn.sigmoid(h @ w3 + b3)                       # (N, Cout)
    s_col = s.reshape(N, Cout, 1)

    # ---- NCHW-native operands for the main kernel (no transposes; the
    # reshape is a free view, weight reshapes are negligible).
    x_flat = x_nchw.reshape(N, Cin, HW)                   # (N, Cin, HW)
    w1t = jnp.transpose(w1)                               # (Cout, Cin)
    b1c = b1.reshape(Cout, 1)                             # (Cout, 1)

    T = _pick_hw_tile(HW, Cin, Cout, jnp.dtype(x_nchw.dtype).itemsize)
    grid = (N, HW // T)

    out = pl.pallas_call(
        _ca_scale_kernel,
        out_shape=jax.ShapeDtypeStruct((N, Cout, HW), x_nchw.dtype),
        grid_spec=pltpu.PrefetchScalarGridSpec(
            num_scalar_prefetch=0,
            grid=grid,
            in_specs=[
                pl.BlockSpec((None, Cin, T), lambda n, t: (n, 0, t)),
                pl.BlockSpec((Cout, Cin), lambda n, t: (0, 0)),
                pl.BlockSpec((Cout, 1), lambda n, t: (0, 0)),
                pl.BlockSpec((None, Cout, 1), lambda n, t: (n, 0, 0)),
            ],
            out_specs=pl.BlockSpec((None, Cout, T), lambda n, t: (n, 0, t)),
        ),
        compiler_params=pltpu.CompilerParams(
            dimension_semantics=("parallel", "parallel"),
            vmem_limit_bytes=64 * 1024 * 1024),
    )(x_flat, w1t, b1c, s_col)

    # (N, Cout, HW) -> (N, Cout, H, W): free view, no transpose.
    return out.reshape(N, Cout, H, W)


def _reference(x_nchw, w1, b1, w2, b2, w3, b3):
    """Pure-JAX reference mirroring the PyTorch forward (conv -> pool -> SE)."""
    x = jnp.transpose(x_nchw, (0, 2, 3, 1))               # NHWC
    out = jnp.einsum("nhwc,cd->nhwd", x, w1) + b1
    y = jnp.mean(out, axis=(1, 2), keepdims=True)         # (N,1,1,Cout)
    h = jnp.maximum(jnp.einsum("nhwc,cd->nhwd", y, w2) + b2, 0.0)
    s = jax.nn.sigmoid(jnp.einsum("nhwc,cd->nhwd", h, w3) + b3)
    ret = s * out
    return jnp.transpose(ret, (0, 3, 1, 2))               # NCHW


if __name__ == "__main__":
    # Small shapes consistent with the module: reduction=16 => Cout >= 16.
    N, Cin, H, W = 2, 16, 16, 16
    Cout, reduction = 32, 16
    Cmid = Cout // reduction

    key = jax.random.PRNGKey(0)
    kx, k1, kb1, k2, kb2, k3, kb3 = jax.random.split(key, 7)

    x = jax.random.normal(kx, (N, Cin, H, W), dtype=jnp.float32)

    # Deterministic synthetic params. PyTorch conv weight (Cout,Cin,1,1) kept
    # directly in matmul form (Cin, Cout) etc.
    w1 = 0.1 * jax.random.normal(k1, (Cin, Cout), dtype=jnp.float32)
    b1 = 0.1 * jax.random.normal(kb1, (1, Cout), dtype=jnp.float32)
    w2 = 0.1 * jax.random.normal(k2, (Cout, Cmid), dtype=jnp.float32)
    b2 = 0.1 * jax.random.normal(kb2, (1, Cmid), dtype=jnp.float32)
    w3 = 0.1 * jax.random.normal(k3, (Cmid, Cout), dtype=jnp.float32)
    b3 = 0.1 * jax.random.normal(kb3, (1, Cout), dtype=jnp.float32)

    result = jax.jit(ca_layer)(x, w1, b1, w2, b2, w3, b3)
    jax.block_until_ready(result)

    ref = _reference(x, w1, b1, w2, b2, w3, b3)
    assert result.shape == (N, Cout, H, W)
    assert jnp.allclose(result, ref, atol=2e-5, rtol=1e-5), float(
        jnp.max(jnp.abs(result - ref)))

    print("KERNEL_OK")
</pallas_src>

<mosaic_0001>
module attributes {stable_mosaic.version = 11 : i64} {
  func.func @_ca_scale_kernel(%arg0: i32, %arg1: i32, %arg2: memref<1x16x256xf32, #tpu.memory_space<vmem>>, %arg3: memref<32x16xf32, #tpu.memory_space<vmem>>, %arg4: memref<32x1xf32, #tpu.memory_space<vmem>>, %arg5: memref<1x32x1xf32, #tpu.memory_space<vmem>>, %arg6: memref<1x32x256xf32, #tpu.memory_space<vmem>>) attributes {dimension_semantics = [#tpu.dimension_semantics<parallel>, #tpu.dimension_semantics<parallel>], iteration_bounds = array<i64: 2, 1>, scalar_prefetch = 0 : i64, scratch_operands = 0 : i64, tpu.core_type = #tpu.core_type<tc>, window_params = [{transform_indices = @transform_0, window_bounds = array<i64: 1, 16, 256>}, {pipeline_mode = #tpu.pipeline_mode<synchronous>, transform_indices = @transform_1, window_bounds = array<i64: 32, 16>}, {pipeline_mode = #tpu.pipeline_mode<synchronous>, transform_indices = @transform_2, window_bounds = array<i64: 32, 1>}, {transform_indices = @transform_3, window_bounds = array<i64: 1, 32, 1>}, {transform_indices = @transform_4, window_bounds = array<i64: 1, 32, 256>}]} {
    %c0 = arith.constant 0 : index
    %c0_0 = arith.constant 0 : index
    %c0_1 = arith.constant 0 : index
    %0 = vector.load %arg2[%c0, %c0_0, %c0_1] : memref<1x16x256xf32, #tpu.memory_space<vmem>>, vector<1x16x256xf32>
    %1 = vector.shape_cast %0 : vector<1x16x256xf32> to vector<16x256xf32>
    %c0_2 = arith.constant 0 : index
    %c0_3 = arith.constant 0 : index
    %2 = vector.load %arg3[%c0_2, %c0_3] : memref<32x16xf32, #tpu.memory_space<vmem>>, vector<32x16xf32>
    %cst = arith.constant dense<0.000000e+00> : vector<32x256xf32>
    %3 = tpu.matmul %2, %1, %cst {dimension_numbers = #tpu.dot_dimension_numbers<[1], [0], [0], [1], [0, 0, 1, 1], [], []>} : vector<32x16xf32>, vector<16x256xf32>, vector<32x256xf32> -> vector<32x256xf32>
    %c0_4 = arith.constant 0 : index
    %c0_5 = arith.constant 0 : index
    %4 = vector.load %arg4[%c0_4, %c0_5] : memref<32x1xf32, #tpu.memory_space<vmem>>, vector<32x1xf32>
    %5 = vector.broadcast %4 : vector<32x1xf32> to vector<32x256xf32>
    %6 = arith.addf %3, %5 : vector<32x256xf32>
    %c0_6 = arith.constant 0 : index
    %c0_7 = arith.constant 0 : index
    %c0_8 = arith.constant 0 : index
    %7 = vector.load %arg5[%c0_6, %c0_7, %c0_8] : memref<1x32x1xf32, #tpu.memory_space<vmem>>, vector<1x32x1xf32>
    %8 = vector.shape_cast %7 : vector<1x32x1xf32> to vector<32x1xf32>
    %9 = vector.broadcast %8 : vector<32x1xf32> to vector<32x256xf32>
    %10 = arith.mulf %6, %9 : vector<32x256xf32>
    %c0_9 = arith.constant 0 : index
    %c0_10 = arith.constant 0 : index
    %c0_11 = arith.constant 0 : index
    %11 = vector.load %arg6[%c0_9, %c0_10, %c0_11] : memref<1x32x256xf32, #tpu.memory_space<vmem>>, vector<1x32x256xf32>
    %12 = vector.shape_cast %11 : vector<1x32x256xf32> to vector<32x256xf32>
    %13 = vector.shape_cast %10 : vector<32x256xf32> to vector<1x32x256xf32>
    tpu.vector_store %arg6[%c0_9, %c0_10, %c0_11], %13 {strides = array<i32>} : memref<1x32x256xf32, #tpu.memory_space<vmem>>, vector<1x32x256xf32>,
    return
  }
  func.func @transform_0(%arg0: i32, %arg1: i32) -> (i32, i32, i32) {
    %c0_i32 = arith.constant 0 : i32
    %c0_i32_0 = arith.constant 0 : i32
    return %arg0, %c0_i32, %arg1 : i32, i32, i32
  }
  func.func @transform_1(%arg0: i32, %arg1: i32) -> (i32, i32) {
    %c0_i32 = arith.constant 0 : i32
    %c0_i32_0 = arith.constant 0 : i32
    %c0_i32_1 = arith.constant 0 : i32
    return %c0_i32, %c0_i32_0 : i32, i32
  }
  func.func @transform_2(%arg0: i32, %arg1: i32) -> (i32, i32) {
    %c0_i32 = arith.constant 0 : i32
    %c0_i32_0 = arith.constant 0 : i32
    %c0_i32_1 = arith.constant 0 : i32
    return %c0_i32, %c0_i32_0 : i32, i32
  }
  func.func @transform_3(%arg0: i32, %arg1: i32) -> (i32, i32, i32) {
    %c0_i32 = arith.constant 0 : i32
    %c0_i32_0 = arith.constant 0 : i32
    %c0_i32_1 = arith.constant 0 : i32
    return %arg0, %c0_i32, %c0_i32_0 : i32, i32, i32
  }
  func.func @transform_4(%arg0: i32, %arg1: i32) -> (i32, i32, i32) {
    %c0_i32 = arith.constant 0 : i32
    %c0_i32_0 = arith.constant 0 : i32
    return %arg0, %c0_i32, %arg1 : i32, i32, i32
  }
}

</mosaic_0001>

<bundles_post_ra>
// kernel: ca_layer.1
= control target key start
LH: loop header
LB: loop body
LE: loop exit
PB: predicated region body
PF: predicated region fallthrough
CT: control target
= control target key end

     0   :  { %s1328_s0 = inlined_call_operand.hbm [shape: f32[2,16,256], index: 0, kind: input, shape index: {}]   ;;  %s1329_s1 = inlined_call_operand.hbm [shape: f32[32,16], index: 1, kind: input, shape index: {}]   ;;  %s1330_s2 = inlined_call_operand.hbm [shape: f32[32,1], index: 2, kind: input, shape index: {}]   ;;  %s1331_s3 = inlined_call_operand.hbm [shape: f32[2,32,1], index: 3, kind: input, shape index: {}]   ;;  %s1332_s4 = inlined_call_operand.hbm [shape: f32[2,32,256], index: 4, kind: output, shape index: {}]  }
   0x1   :  { %1340 = sst [smem:[#allocation15_spill]] %s1328_s0 }
   0x2   :  { %1341 = sst [smem:[#allocation16_spill]] %s1329_s1 }
   0x3   :  { %1342 = sst [smem:[#allocation17_spill]] %s1330_s2 }
   0x4   :  { %9 = vsyncpa [#allocation3], 0 }
   0x5   :  { %11 = vsyncpa [#allocation3 + $0x1], 0 }
   0x6   :  { %12 = vsyncpa [#allocation6], 0 }
   0x7   :  { %13 = vsyncpa [#allocation9], 0 }
   0x8   :  { %15 = vsyncpa [#allocation9 + $0x1], 0 }
   0x9   :  { %16 = vsyncpa [#allocation4], 0 }
   0xa   :  { %18 = vsyncpa [#allocation4 + $0x1], 0  ;;  %s1004_s15 = smov 0   ;;  %s1006_s16 = smov 0  }
   0xb   :  { %s1008_s17 = smov 0   ;;  %s1010_s18 = smov 0  }
   0xc   :  { %s1012_s19 = smov 0   ;;  %s1014_s20 = smov 0  }
   0xd LB: > { %s624_s21 = sadd.s32 4294967295, %s964_s20   ;;  %s625_s22 = sadd.s32 4294967294, %s964_s20   ;;  %s964_s20 = sphi %s1014_s20, %s24_s20   ;;  %s960_s19 = sphi %s1012_s19, %s1366_s19   ;;  %s956_s18 = sphi %s1010_s18, %s1365_s18   ;;  %s952_s17 = sphi %s1008_s17, %s1364_s17   ;;  %s948_s16 = sphi %s1006_s16, %s1363_s16   ;;  %s944_s15 = sphi %s1004_s15, %s1362_s15  }
   0xe   : > { %p58_p0 = scmp.ne.s32.totalorder %s948_s16, %s944_s15  ;;  %p1038_p1 = scmp.eq.s32.totalorder %s624_s21, 0 }
   0xf   : > { %p1042_p2 = scmp.eq.s32.totalorder %s624_s21, 1  ;;  %p158_p3 = scmp.eq.s32.totalorder %s625_s22, 1 }
  0x10   : > { %s1343_s23 = scalar_select %p1038_p1, 1, 0 }
  0x11   : > { %p1048_p4 = por %p1038_p1, %p58_p0  ;;  %p626_p5 = scmp.ge.s32.totalorder %s964_s20, 1 }
  0x12   : > { %p1053_p6 = por %p158_p3, %p58_p0  ;;  %p165_p7 = scmp.lt.s32.totalorder %s964_s20, 3 }
  0x13   : > { %s1345_s25 = scalar_select %p1048_p4, 1, 0 }
  0x14   : > { %s1346_s26 = scalar_select %p1053_p6, 1, 0 }
  0x15   : > { %p1058_p8 = pnand %p626_p5, %p165_p7  ;;  %s966_s28 = smov [#allocation5]  }
  0x16   : > { %s177_s29 = sshll.u32 %s966_s28, 4  ;;  %s967_s5 = smov [#allocation7]   ;;  %s1062_s29 = int_to_ptr.vmem [resolvable:$true] %s177_s29 }
  0x17   : > { %p674_p9 = pneg %p1058_p8  ;;  %s190_s6 = sshll.u32 %s967_s5, 4  ;;  %s1073_s6 = int_to_ptr.vmem [resolvable:$true] %s190_s6 }
  0x18   : > { %s1349_s1 = sld [smem:[#allocation16_spill]] }
  0x19   : > { %p1069_p11 = pnand %p674_p9, %p1038_p1 }
  0x1b   : > { %p760_p13 = pneg %p1069_p11 }
  0x1e   : > { %s758_s9 = scalar_lea.hbm %s1349_s1, 512 }
  0x1f   : > { %p759_p12 = scmp.ne.s32.totalorder %s1349_s1, %s758_s9  ;;  %p765_p5 = scmp.lt.u32.totalorder %s758_s9, %s1349_s1 }
  0x21   : > { %p761_p0 = pnand %p760_p13, %p759_p12 }
  0x23   : > { %p762_p3 = pneg %p761_p0 }
  0x25   : > { %p767_p7 = pnand %p765_p5, %p762_p3 }
  0x27   : > { %770 = shalt.err (!%p767_p7)
}
  0x28   : > { %s771_s14 = scalar_lea.vmem %s1062_s29, 512  ;;  %p779_p1 = scmp.lt.s32.totalorder %s1062_s29, %s1062_s29 }
  0x29   : > { %p772_p9 = scmp.ne.s32.totalorder %s1062_s29, %s771_s14  ;;  %p780_p12 = scmp.lt.s32.totalorder %s771_s14, %s771_s14 }
  0x2b   : > { %p774_p10 = pnand %p772_p9, %p760_p13  ;;  %p781_p0 = por %p780_p12, %p779_p1 }
  0x2d   : > { %p775_p6 = pneg %p774_p10 }
  0x2f   : > { %p782_p4 = pnand %p781_p0, %p775_p6 }
  0x31   : > { %785 = shalt.err (!%p782_p4)
}
  0x32   : > { %s1336_s21 = smov 128   ;;  %s1337_s22 = smov 8  }
  0x33   : > { %677 = dma.hbm_to_vmem [thread:$0]  (!%p1069_p11), %s1349_s1, 512, %s1062_s29, [#allocation6], %s1336_s21, %s1336_s21, %s1337_s22  }
  0x34   : > { %s1350_s2 = sld [smem:[#allocation17_spill]] }
  0x3a   : > { %s786_s9 = scalar_lea.hbm %s1350_s2, 512 }
  0x3b   : > { %p787_p1 = scmp.ne.s32.totalorder %s1350_s2, %s786_s9  ;;  %p793_p10 = scmp.lt.u32.totalorder %s786_s9, %s1350_s2 }
  0x3d   : > { %p789_p4 = pnand %p787_p1, %p760_p13 }
  0x3f   : > { %p790_p6 = pneg %p789_p4 }
  0x41   : > { %p795_p3 = pnand %p793_p10, %p790_p6 }
  0x43   : > { %798 = shalt.err (!%p795_p3)
}
  0x44   : > { %s799_s29 = scalar_lea.vmem %s1073_s6, 512  ;;  %p807_p12 = scmp.lt.s32.totalorder %s1073_s6, %s1073_s6 }
  0x45   : > { %p800_p5 = scmp.ne.s32.totalorder %s1073_s6, %s799_s29  ;;  %p808_p0 = scmp.lt.s32.totalorder %s799_s29, %s799_s29 }
  0x47   : > { %p802_p7 = pnand %p800_p5, %p760_p13  ;;  %p809_p1 = por %p808_p0, %p807_p12 }
  0x49   : > { %p803_p9 = pneg %p802_p7 }
  0x4b   : > { %p810_p4 = pnand %p809_p1, %p803_p9 }
  0x4d   : > { %813 = shalt.err (!%p810_p4)
}
  0x4e   : > { %680 = dma.hbm_to_vmem [thread:$0]  (!%p1069_p11), %s1350_s2, 512, %s1073_s6, [#allocation6], %s1336_s21, %s1336_s21, %s1337_s22  }
  0x4f   : > { %s36_s30 = sadd.s32 1, %s960_s19  ;;  %s45_s5 = sadd.s32 1, %s952_s17 }
  0x50   : > { %p38_p13 = scmp.ge.s32.totalorder %s36_s30, 2  ;;  %p52_p6 = scmp.ne.s32.totalorder %s952_s17, %s948_s16 }
  0x51   : > { %p53_p10 = scmp.eq.s32.totalorder %s964_s20, 0  ;;  %p694_p3 = scmp.lt.s32.totalorder %s964_s20, 2 }
  0x52   : > { %s1368_s30 = smov (%p38_p13, %s36_s30), 0  ;;  %p1143_p7 = por %p1042_p2, %p52_p6 }
  0x53   : > { %p54_p5 = por %p53_p10, %p52_p6  ;;  %s40_s8 = ssub.s32 %s960_s19, %s1368_s30 }
  0x54   : > { %s1351_s7 = scalar_select %p1143_p7, 1, 0 }
  0x55   : > { %s1150_s9 = sand.u32 1, %s952_s17   ;;  %p43_p11 = scmp.eq.s32.totalorder %s40_s8, 0 }
  0x56   : > { %s1338_s6 = sshll.u32 %s1150_s9, 5  ;;  %s651_s10 = sshll.u32 %s960_s19, 9 }
  0x57   : > { %s1155_s11 = scalar_select %p43_p11, %s952_s17, %s45_s5  }
  0x58   : > { %s1352_s0 = sld [smem:[#allocation15_spill]]  ;;  %s208_s29 = scalar_lea.vmem [#allocation2], %s1338_s6 }
  0x59   : > { %s217_s14 = sshll.u32 %s208_s29, 4  ;;  %p1168_p2 = pnand %p694_p3, %p54_p5  ;;  %s1172_s14 = int_to_ptr.vmem [resolvable:$true] %s217_s14 }
  0x5a   : > { %s205_s5 = scalar_lea.sflag [#allocation3], %s1150_s9 }
  0x5b   : > { %p816_p12 = pneg %p1168_p2 }
  0x5e   : > { %s1162_s24 = scalar_lea.hbm %s1352_s0, %s651_s10  ;;  %s819_s29 = scalar_lea.hbm %s1352_s0, 1024 }
  0x5f   : > { %s814_s8 = scalar_lea.hbm %s1162_s24, 512  ;;  %p820_p4 = scmp.lt.u32.totalorder %s1162_s24, %s1352_s0 }
  0x60   : > { %p815_p9 = scmp.ne.s32.totalorder %s1162_s24, %s814_s8  ;;  %p821_p13 = scmp.lt.u32.totalorder %s819_s29, %s814_s8 }
  0x61   : > { %p823_p10 = scmp.lt.u32.totalorder %s814_s8, %s1162_s24 }
  0x62   : > { %p817_p0 = pnand %p816_p12, %p815_p9  ;;  %p822_p6 = por %p821_p13, %p820_p4 }
  0x64   : > { %p818_p1 = pneg %p817_p0  ;;  %p824_p3 = por %p823_p10, %p822_p6 }
  0x66   : > { %p825_p5 = pnand %p824_p3, %p818_p1 }
  0x68   : > { %828 = shalt.err (!%p825_p5)
}
  0x69   : > { %s829_s6 = scalar_lea.vmem %s1172_s14, 512  ;;  %s970_s12 = smov [#allocation2]  }
  0x6a   : > { %p830_p11 = scmp.ne.s32.totalorder %s1172_s14, %s829_s6  ;;  %s834_s13 = sshll.u32 %s970_s12, 4  ;;  %s835_s13 = int_to_ptr.vmem [resolvable:$false] %s834_s13 }
  0x6b   : > { %s836_s21 = scalar_lea.vmem %s835_s13, 1024  ;;  %p837_p7 = scmp.lt.s32.totalorder %s1172_s14, %s835_s13 }
  0x6c   : > { %p832_p9 = pnand %p830_p11, %p816_p12  ;;  %p838_p4 = scmp.lt.s32.totalorder %s836_s21, %s829_s6 }
  0x6e   : > { %p833_p0 = pneg %p832_p9  ;;  %p839_p13 = por %p838_p4, %p837_p7 }
  0x70   : > { %p840_p6 = pnand %p839_p13, %p833_p0 }
  0x72   : > { %843 = shalt.err (!%p840_p6)
}
  0x73   : > { %s971_s22 = smov 256   ;;  %s972_s8 = smov 16  }
  0x74   : > { %684 = dma.hbm_to_vmem [thread:$0]  (!%p1168_p2), %s1162_s24, 512, %s1172_s14, %s205_s5, %s971_s22, %s971_s22, %s972_s8  }
  0x75   : > { %s1207_s6 = scalar_lea.hbm %s1331_s3, %s651_s10  ;;  %s1354_s13 = sshll.u32 %s1150_s9, 5 }
  0x76   : > { %s231_s21 = scalar_lea.vmem [#allocation8], %s1354_s13  ;;  %s228_s1 = scalar_lea.sflag [#allocation9], %s1150_s9 }
  0x77   : > { %s238_s0 = sshll.u32 %s231_s21, 4  ;;  %s844_s2 = scalar_lea.hbm %s1207_s6, 512  ;;  %s1211_s0 = int_to_ptr.vmem [resolvable:$true] %s238_s0 }
  0x78   : > { %p845_p7 = scmp.ne.s32.totalorder %s1207_s6, %s844_s2  ;;  %s849_s10 = scalar_lea.hbm %s1331_s3, 1024 }
  0x79   : > { %p850_p3 = scmp.lt.u32.totalorder %s1207_s6, %s1331_s3  ;;  %p851_p5 = scmp.lt.u32.totalorder %s849_s10, %s844_s2 }
  0x7a   : > { %p847_p1 = pnand %p845_p7, %p816_p12  ;;  %p853_p9 = scmp.lt.u32.totalorder %s844_s2, %s1207_s6 }
  0x7b   : > { %p852_p11 = por %p851_p5, %p850_p3 }
  0x7c   : > { %p848_p10 = pneg %p847_p1 }
  0x7d   : > { %p854_p0 = por %p853_p9, %p852_p11 }
  0x7f   : > { %p855_p4 = pnand %p854_p0, %p848_p10 }
  0x81   : > { %858 = shalt.err (!%p855_p4)
}
  0x82   : > { %s859_s8 = scalar_lea.vmem %s1211_s0, 512  ;;  %s973_s29 = smov [#allocation8]  }
  0x83   : > { %p860_p13 = scmp.ne.s32.totalorder %s1211_s0, %s859_s8  ;;  %s864_s12 = sshll.u32 %s973_s29, 4  ;;  %s865_s12 = int_to_ptr.vmem [resolvable:$false] %s864_s12 }
  0x84   : > { %s866_s13 = scalar_lea.vmem %s865_s12, 1024  ;;  %p867_p1 = scmp.lt.s32.totalorder %s1211_s0, %s865_s12 }
  0x85   : > { %p862_p6 = pnand %p860_p13, %p816_p12  ;;  %p868_p3 = scmp.lt.s32.totalorder %s866_s13, %s859_s8 }
  0x87   : > { %p863_p7 = pneg %p862_p6  ;;  %p869_p5 = por %p868_p3, %p867_p1 }
  0x89   : > { %p870_p11 = pnand %p869_p5, %p863_p7 }
  0x8b   : > { %873 = shalt.err (!%p870_p11)
}
  0x8c   : > { %s1355_s2 = smov 8   ;;  %s1356_s21 = smov 128  }
  0x8d   : > { %687 = dma.hbm_to_vmem [thread:$0]  (!%p1168_p2), %s1207_s6, 512, %s1211_s0, %s228_s1, %s1356_s21, %s1356_s21, %s1355_s2  }
  0x8e   : > { %250 = sbr.rel (%p1058_p8) target bundleno = 398 (0x18e), region = 36  ;;  %s1245_s24 = sand.u32 (!%p1058_p8), 1, %s948_s16  }
  0x8f   : > { %s637_s14 = sshll.u32 (!%p1058_p8), %s1245_s24, 5  ;;  %s253_s10 = scalar_lea.sflag (!%p1058_p8), [#allocation3], %s1245_s24 }
  0x90   : > { %s256_s28 = scalar_lea.vmem (!%p1058_p8), [#allocation2], %s637_s14  ;;  %p1357_p12 = scmp.ne.s32.totalorder (!%p1058_p8), %s1345_s25, 0 }
  0x95   : > { %927 = dma.done.wait (%p1357_p12), %s253_s10, 512  }
  0x96   : > { %929 = vsyncadd (%p1357_p12), %s253_s10, 4294966784  ;;  %p1358_p10 = scmp.ne.s32.totalorder %s1343_s23, 0 }
  0x98   : > { %931 = dma.done.wait (%p1358_p10), [#allocation6], 1024  }
  0x99   : > { %933 = vsyncadd (%p1358_p10), [#allocation6], 4294966272  ;;  %s270_s0 = scalar_lea.sflag [#allocation9], %s1245_s24  ;;  %s1258_s1 = scalar_lea.vmem [#allocation8], %s637_s14 }
  0x9a   : > { %935 = dma.done.wait (%p1357_p12), %s270_s0, 512  }
  0x9b   : > { %937 = vsyncadd (%p1357_p12), %s270_s0, 4294966784  ;;  %v974_v0 = vmov 0.0   ;;  %v975_v1 = vmov 0   ;;  %v306_v2 = vld [vmem:[%s256_s28 + $0x8] sm:$0xff]  ;;  %v308_v3 = vld [vmem:[%s256_s28 + $0x18] sm:$0xff]  ;;  %vm337_vm0 = vcmask 130048  }
  0x9c   : > { %414 = vmatprep.mubr.f32.mxu0 %v974_v0  ;;  %426 = vmatprep.mubr.f32.mxu1 %v974_v0  ;;  %v305_v4 = vld [vmem:[%s256_s28] sm:$0xff]  ;;  %v654_v5 = vpack.c.bf16 %v308_v3, %v306_v2  ;;  %v307_v6 = vld [vmem:[%s256_s28 + $0x10] sm:$0xff]  ;;  %v316_v12 = vld [vmem:[#allocation7 + $0x18] sm:$0xff]  ;;  %s641_s23 = sshll.u32 %s1245_s24, 6  ;;  %s653_s9 = sshll.u32 %s956_s18, 10 }
  0x9d   : > { %757 = vset.pattern.permute.xlu1 %v975_v1  ;;  %756 = vset.pattern.permute.xlu0 %v975_v1  ;;  %v656_v7 = vpack.c.bf16 %v307_v6, %v305_v4  ;;  %v315_v8 = vld [vmem:[#allocation7 + $0x10] sm:$0xff]  ;;  %v313_v9 = vld [vmem:[#allocation7] sm:$0xff]  ;;  %v314_v13 = vld [vmem:[#allocation7 + $0x8] sm:$0xff]  ;;  %s302_s25 = scalar_lea.vmem [#allocation10], %s641_s23  ;;  %s1279_s5 = scalar_lea.hbm %s1332_s4, %s653_s9 }
  0x9e   : > { %655 = vmatprep.subr.bf16.mxu0 %v654_v5  ;;  %658 = vmatprep.subr.bf16.mxu1 %v654_v5  ;;  %v309_v10 = vld [vmem:[#allocation5] sm:$0xff]  ;;  %v311_v11 = vld [vmem:[#allocation5 + $0x10] sm:$0xff]  ;;  %v310_v14 = vld [vmem:[#allocation5 + $0x8] sm:$0xff]  ;;  %s495_s27 = sshll.u32 %s302_s25, 4  ;;  %s480_s22 = scalar_lea.sflag [#allocation4], %s1245_s24  ;;  %s1274_s27 = int_to_ptr.vmem [resolvable:$true] %s495_s27 }
  0x9f   : > { %657 = vmatpush1.bf16.msra.mxu0 %v656_v7  ;;  %659 = vmatpush1.bf16.msra.mxu1 %v656_v7  ;;  %v312_v15 = vld [vmem:[#allocation5 + $0x18] sm:$0xff]  ;;  %v440_v16 = vld [vmem:[%s1258_s1 + $0x8] sm:$0xff]  ;;  %v439_v17 = vld [vmem:[%s1258_s1] sm:$0xff]  ;;  %s874_s8 = scalar_lea.vmem %s1274_s27, 1024  ;;  %p1359_p2 = scmp.ne.s32.totalorder %s1351_s7, 0 }
  0xa0   : > { %329 = vperm.xlu1 %757, %v315_v8   ;;  %319 = vperm.xlu0 %756, %v313_v9   ;;  %v442_v18 = vld [vmem:[%s1258_s1 + $0x18] sm:$0xff]  ;;  %v441_v19 = vld [vmem:[%s1258_s1 + $0x10] sm:$0xff]  ;;  %p875_p8 = scmp.ne.s32.totalorder %s1274_s27, %s874_s8  ;;  %s976_s29 = smov [#allocation10]  }
  0xa1   : > { %s878_s12 = sshll.u32 %s976_s29, 4  ;;  %s879_s12 = int_to_ptr.vmem [resolvable:$false] %s878_s12 }
  0xa2   : > { %642 = vmatmul.mubr.msk.f32.vlgmr.msra.gmra.mrb[0].mxu0 %vm337_vm0, %v309_v10  ;;  %644 = vmatmul.mubr.msk.f32.vlgmr.msra.gmra.mrb[0].mxu1 %vm337_vm0, %v311_v11  ;;  %p876_p9 = pnand %p875_p8, %p1359_p2  ;;  %s880_s13 = scalar_lea.vmem %s879_s12, 2048 }
  0xa3   : > { %420 = vmatprep.mubr.f32.mxu0 %v974_v0  ;;  %432 = vmatprep.mubr.f32.mxu1 %v974_v0  ;;  %p881_p4 = scmp.lt.s32.totalorder %s1274_s27, %s879_s12  ;;  %p882_p13 = scmp.lt.s32.totalorder %s880_s13, %s874_s8 }
  0xa4   : > { %334 = vperm.xlu1 %757, %v316_v12   ;;  %324 = vperm.xlu0 %756, %v314_v13   ;;  %p877_p0 = pneg %p876_p9 }
  0xa5   : > { %p883_p6 = por %p882_p13, %p881_p4 }
  0xa6   : > { %643 = vmatmul.mubr.msk.f32.gmra.mrb[2].mxu0 %vm337_vm0, %v310_v14  ;;  %645 = vmatmul.mubr.msk.f32.gmra.mrb[2].mxu1 %vm337_vm0, %v312_v15 }
  0xa7   : > { %p884_p7 = pnand %p883_p6, %p877_p0 }
  0xa8   : > { %450 = vperm.xlu1 %757, %v440_v16   ;;  %445 = vperm.xlu0 %756, %v439_v17  }
  0xac   : > { %460 = vperm.xlu1 %757, %v442_v18   ;;  %455 = vperm.xlu0 %756, %v441_v19  }
 0x11f   : > { %v320_v20 = vpop.permute.xlu0 %319  ;;  %v330_v21 = vpop.permute.xlu1 %329 }
 0x123   : > { %v325_v22 = vpop.permute.xlu0 %324  ;;  %v335_v23 = vpop.permute.xlu1 %334 }
 0x127   : > { %v446_v24 = vpop.permute.xlu0 %445  ;;  %v451_v25 = vpop.permute.xlu1 %450 }
 0x12b   : > { %v456_v32 = vpop.permute.xlu0 %455  ;;  %v461_v45 = vpop.permute.xlu1 %460 }
 0x175   : > { %v416_v26 = vpop.f32.mrb[0].mxu0  ;;  %v428_v27 = vpop.f32.mrb[0].mxu1 }
 0x176   : > { %v417_v28 = vadd.f32 %v416_v26, %v320_v20  ;;  %v429_v29 = vadd.f32 %v428_v27, %v330_v21  ;;  %v418_v30 = vpop.f32.mrb[1].mxu0  ;;  %v430_v31 = vpop.f32.mrb[1].mxu1 }
 0x177   : > { %v419_v33 = vadd.f32 %v418_v30, %v320_v20  ;;  %v431_v34 = vadd.f32 %v430_v31, %v330_v21 }
 0x178   : > { %v463_v35 = vmul.f32 %v446_v24, %v417_v28  ;;  %v467_v36 = vmul.f32 %v456_v32, %v429_v29 }
 0x179   : > { %v464_v37 = vmul.f32 %v446_v24, %v419_v33  ;;  %v468_v38 = vmul.f32 %v456_v32, %v431_v34  ;;  %v422_v39 = vpop.f32.mrb[2].mxu0  ;;  %v434_v40 = vpop.f32.mrb[2].mxu1 }
 0x17a   : > { %471 = vst [vmem:[%s302_s25] sm:$0xff] %v463_v35  ;;  %475 = vst [vmem:[%s302_s25 + $0x20] sm:$0xff] %v467_v36  ;;  %v423_v41 = vadd.f32 %v422_v39, %v325_v22  ;;  %v435_v42 = vadd.f32 %v434_v40, %v335_v23  ;;  %v424_v43 = vpop.f32.mrb[3].mxu0  ;;  %v436_v44 = vpop.f32.mrb[3].mxu1 }
 0x17b   : > { %472 = vst [vmem:[%s302_s25 + $0x8] sm:$0xff] %v464_v37  ;;  %476 = vst [vmem:[%s302_s25 + $0x28] sm:$0xff] %v468_v38  ;;  %v425_v46 = vadd.f32 %v424_v43, %v325_v22  ;;  %v437_v47 = vadd.f32 %v436_v44, %v335_v23 }
 0x17c   : > { %v465_v48 = vmul.f32 %v451_v25, %v423_v41  ;;  %v469_v49 = vmul.f32 %v461_v45, %v435_v42 }
 0x17d   : > { %v466_v50 = vmul.f32 %v451_v25, %v425_v46  ;;  %v470_v51 = vmul.f32 %v461_v45, %v437_v47 }
 0x17e   : > { %473 = vst [vmem:[%s302_s25 + $0x10] sm:$0xff] %v465_v48  ;;  %477 = vst [vmem:[%s302_s25 + $0x30] sm:$0xff] %v469_v49 }
 0x17f   : > { %474 = vst [vmem:[%s302_s25 + $0x18] sm:$0xff] %v466_v50  ;;  %478 = vst [vmem:[%s302_s25 + $0x38] sm:$0xff] %v470_v51 }
 0x180   : > { %887 = shalt.err (!%p884_p7)
}
 0x181   : > { %s888_s2 = scalar_lea.hbm %s1279_s5, 1024  ;;  %s892_s10 = scalar_lea.hbm %s1332_s4, 2048 }
 0x182   : > { %p889_p1 = scmp.ne.s32.totalorder %s1279_s5, %s888_s2  ;;  %p893_p11 = scmp.lt.u32.totalorder %s1279_s5, %s1332_s4 }
 0x183   : > { %p894_p12 = scmp.lt.u32.totalorder %s892_s10, %s888_s2  ;;  %p896_p8 = scmp.lt.u32.totalorder %s888_s2, %s1279_s5 }
 0x184   : > { %p890_p3 = pnand %p889_p1, %p1359_p2 }
 0x185   : > { %p895_p10 = por %p894_p12, %p893_p11 }
 0x186   : > { %p891_p5 = pneg %p890_p3 }
 0x187   : > { %p897_p9 = por %p896_p8, %p895_p10 }
 0x189   : > { %p898_p0 = pnand %p897_p9, %p891_p5 }
 0x18b   : > { %901 = shalt.err (!%p898_p0)
}
 0x18c   : > { %s977_s1 = smov 256   ;;  %s978_s23 = smov 16  }
 0x18d   : > { %672 = dma.vmem_to_hbm [thread:$0]  (%p1359_p2), %s1274_s27, 1024, %s1279_s5, %s480_s22, %s977_s1, %s977_s1, %s978_s23  }
 0x18e PF: > { %s510_s25 = sand.u32 1, %s944_s15   ;;  %p1360_p4 = scmp.ne.s32.totalorder %s1346_s26, 0 }
 0x18f   : > { %p1361_p13 = scmp.ge.s32.totalorder %s964_s20, 2  ;;  %s511_s9 = scalar_lea.sflag [#allocation4], %s510_s25 }
 0x191   : > { %p689_p6 = pnand %p1361_p13, %p1360_p4 }
 0x193   : > { %939 = dma.done.wait (!%p689_p6), %s511_s9, 1024  }
 0x194   : > { %941 = vsyncadd (!%p689_p6), %s511_s9, 4294966272  ;;  %s24_s20 = sadd.s32 1, %s964_s20   ;;  %s1362_s15 = smov %s948_s16 }
 0x195   : > { %p21_p7 = scmp.ge.s32.totalorder %s24_s20, 4   ;;  %s1363_s16 = smov %s952_s17 }
 0x196   : > { %s1364_s17 = smov %s1155_s11  ;;  %s1365_s18 = smov %s960_s19 }
 0x197   : > { %s1366_s19 = smov %s1368_s30  ;;  %23 = sbr.rel (!%p21_p7) target bundleno = 13 (0xd), region = 102 }
 0x19e   :  { %516 = vsyncpa [#allocation3], 1 }
 0x19f   :  { %518 = vsyncpa [#allocation3 + $0x1], 1 }
 0x1a0   :  { %519 = vsyncpa [#allocation6], 1 }
 0x1a1   :  { %520 = vsyncpa [#allocation9], 1 }
 0x1a2   :  { %522 = vsyncpa [#allocation9 + $0x1], 1 }
 0x1a3   :  { %523 = vsyncpa [#allocation4], 1 }
 0x1a4   :  { %525 = vsyncpa [#allocation4 + $0x1], 1 }

</bundles_post_ra>
